<compile_context>
chip_gen: v5e
topology: v5e:2x2
jax: 0.10.0
libtpu: 0.0.40
codegen_flags: <defaults>
</compile_context>

<pallas_src>
import functools

import jax
import jax.numpy as jnp
from jax import lax
from jax.experimental import pallas as pl
from jax.experimental.pallas import tpu as pltpu


def mha_kernel(x_ref, wqkv_ref, wp_ref, bp_ref, o_ref, *, batch_block, seq_len,
               num_heads, head_size):
    """One grid step = `batch_block` batch elements, rows flattened to (BB*T, C)."""
    T = seq_len
    H = num_heads
    hs = head_size
    hhs = H * hs
    C = x_ref.shape[-1]

    # Fused QKV projection over all BB*T rows: (BB*T, C) @ (C, 3*H*hs), f32 accumulation,
    # then ONE bf16 cast of the whole slab.
    x = x_ref[...].astype(jnp.bfloat16)
    qkv = jnp.dot(x, wqkv_ref[...],
                  preferred_element_type=jnp.float32).astype(jnp.bfloat16)

    # Causal mask / bias broadcast hoisted out of all loops.
    row = lax.broadcasted_iota(jnp.int32, (T, T), 0)
    col = lax.broadcasted_iota(jnp.int32, (T, T), 1)
    causal = row >= col
    neg_big = jnp.float32(-1e30)          # finite: safe even for fully-masked padded rows
    bias_full = jnp.broadcast_to(bp_ref[...].astype(jnp.float32), (T, C))

    for bb in range(batch_block):         # static; BB is small by construction
        r0 = bb * T
        q_b = qkv[r0:r0 + T, 0:hhs]       # (T, H*hs) bf16 (C**-0.5 folded into Q weights)
        k_b = qkv[r0:r0 + T, hhs:2 * hhs]
        v_b = qkv[r0:r0 + T, 2 * hhs:3 * hhs]

        acc = bias_full                   # (T, C) f32; output projection folded in below
        for h in range(H):
            lo = h * hs
            q = q_b[:, lo:lo + hs]        # (T, hs) bf16
            k = k_b[:, lo:lo + hs]
            v = v_b[:, lo:lo + hs]

            # scores = q @ k^T, contracting the shared last dim (no transpose materialized).
            s = lax.dot_general(q, k, dimension_numbers=(((1,), (1,)), ((), ())),
                                preferred_element_type=jnp.float32)      # (T, T) f32
            s = jnp.where(causal, s, neg_big)

            # Numerically-stable softmax in f32; normalization deferred past the PV matmul
            # (scale the (T, hs) output instead of the (T, T) probabilities).
            m = jnp.max(s, axis=-1, keepdims=True)
            e = jnp.exp(s - m)
            l = jnp.sum(e, axis=-1, keepdims=True)
            o_h = jnp.dot(e.astype(jnp.bfloat16), v,
                          preferred_element_type=jnp.float32)             # (T, hs) f32
            o_h = o_h * pl.reciprocal(l, approx=True)

            # Fold the output projection into the head loop: no cat slab, no masked
            # 64-lane stores, no slab write+readback round trip.
            acc = acc + jnp.dot(o_h.astype(jnp.bfloat16), wp_ref[lo:lo + hs, :],
                                preferred_element_type=jnp.float32)       # (T, C) f32

        # Single lane-dense writeback for this batch element (C is a multiple of 128).
        o_ref[r0:r0 + T, :] = acc.astype(o_ref.dtype)


def _pick_batch_block(B, T):
    """Pick BB so each grid step has ~<=256 rows, while keeping >=2 grid steps when B
    allows it (v7x has 2 TensorCores; a 1-step grid leaves one idle)."""
    target_rows = 256
    bb = 1
    for cand in range(1, B + 1):
        if B % cand == 0 and cand * T <= max(target_rows, T):
            bb = cand
    if B // bb < 2 and B >= 2 and B % 2 == 0:
        bb = B // 2
    return max(bb, 1)


def _vmem_cap_bytes():
    try:
        cap = getattr(pltpu.get_tpu_info(), "vmem_capacity_bytes", None)
        if cap:
            return int(cap)
    except Exception:
        pass
    return 64 << 20  # conservative fallback: assume v7x's 64 MiB


def pack_mha_weights(wq, wk, wv, wp, bp, n_embd):
    """One-time weight packing (do at model load, NOT per forward call).

    wq/wk/wv: (H, hs, C) PyTorch Linear weights; wp: (C, H*hs); bp: (1, C) or (C,).
    Returns (wqkv (C, 3*H*hs) bf16, wp_t (H*hs, C) bf16, bp (1, C) f32).
    """
    H, hs, C = wq.shape
    assert C == n_embd
    hhs = H * hs
    scale = jnp.float32(C) ** -0.5        # n_embd scaling, exactly like the PyTorch code

    def to_cols(w):                       # (H, hs, C) -> (C, H*hs); x @ cols == concat_h(x @ w[h].T)
        return jnp.transpose(w, (2, 0, 1)).reshape(C, hhs)

    wqkv = jnp.concatenate([to_cols(wq * scale), to_cols(wk), to_cols(wv)],
                           axis=1).astype(jnp.bfloat16)               # (C, 3*H*hs)
    wp_t = jnp.transpose(wp).astype(jnp.bfloat16)                     # (H*hs, C)
    bp_f32 = bp.reshape(1, -1).astype(jnp.float32)                    # (1, C)
    return wqkv, wp_t, bp_f32


def multi_head_attention_packed(x, wqkv, wp_t, bp, *, num_heads, head_size,
                                out_dtype=None):
    """x: (B, T, C); wqkv: (C, 3*H*hs) bf16; wp_t: (H*hs, C) bf16; bp: (1, C) f32."""
    B, T, C = x.shape
    H, hs = num_heads, head_size
    hhs = H * hs
    out_dtype = x.dtype if out_dtype is None else out_dtype   # pass bf16 to halve writeback

    BB = _pick_batch_block(B, T)
    rows = BB * T
    x2d = x.reshape(B * T, C)             # free; dtype cast happens inside the kernel

    x_isz = jnp.dtype(x.dtype).itemsize
    o_isz = jnp.dtype(out_dtype).itemsize

    # Per-step VMEM estimate (double-buffered blocks + resident weights + live temporaries).
    vmem_est = (
        2 * rows * C * x_isz + 2 * rows * C * o_isz        # x / out blocks, double-buffered
        + (3 * hhs * C + hhs * C) * 2 + C * 4              # resident bf16 weights + f32 bias
        + rows * 3 * hhs * 2                               # bf16 qkv intermediate
        + rows * C * 4                                     # f32 output accumulator
        + 4 * T * T * 4 + 4 * T * hhs * 4                  # softmax / per-head temporaries
    )
    vmem_limit = int(min(max(2 * vmem_est, 16 << 20), _vmem_cap_bytes() - (8 << 20)))

    flops = (2 * B * T * C * 3 * hhs      # fused QKV projection
             + 4 * B * H * T * T * hs     # QK^T and PV matmuls
             + 2 * B * T * hhs * C)       # output projection (folded per head)
    cost = pl.CostEstimate(
        flops=flops,
        transcendentals=B * H * T * T,
        bytes_accessed=B * T * C * (x_isz + o_isz) + (3 * hhs * C + hhs * C) * 2 + C * 4)

    kernel = functools.partial(mha_kernel, batch_block=BB, seq_len=T,
                               num_heads=H, head_size=hs)

    out2d = pl.pallas_call(
        kernel,
        out_shape=jax.ShapeDtypeStruct((B * T, C), out_dtype),
        grid=(B // BB,),
        in_specs=[
            pl.BlockSpec((rows, C), lambda i: (i, 0)),              # x rows for this step
            pl.BlockSpec(memory_space=pltpu.MemorySpace.VMEM),      # W_qkv: resident, no dbl-buf
            pl.BlockSpec(memory_space=pltpu.MemorySpace.VMEM),      # W_proj^T: resident
            pl.BlockSpec(memory_space=pltpu.MemorySpace.VMEM),      # b_proj: resident
        ],
        out_specs=pl.BlockSpec((rows, C), lambda i: (i, 0)),
        compiler_params=pltpu.CompilerParams(
            dimension_semantics=("parallel",),
            vmem_limit_bytes=vmem_limit),
        cost_estimate=cost,
    )(x2d, wqkv, wp_t, bp)
    return out2d.reshape(B, T, C)


def multi_head_attention(x, wq, wk, wv, wp, bp):
    """Convenience wrapper: packs weights then runs the kernel (prefer packing once)."""
    H, hs, C = wq.shape
    packed = pack_mha_weights(wq, wk, wv, wp, bp, C)
    return multi_head_attention_packed(x, *packed, num_heads=H, head_size=hs)


def reference(x, wq, wk, wv, wp, bp):
    """Pure-JAX f32 reference mirroring the PyTorch forward (dropout = identity)."""
    B, T, C = x.shape
    H, hs, _ = wq.shape
    mask = jnp.tril(jnp.ones((T, T), dtype=bool))
    outs = []
    for h in range(H):
        q = x @ wq[h].T
        k = x @ wk[h].T
        v = x @ wv[h].T
        wei = (q @ jnp.swapaxes(k, -2, -1)) * (C ** -0.5)
        wei = jnp.where(mask, wei, -jnp.inf)
        wei = jax.nn.softmax(wei, axis=-1)
        outs.append(wei @ v)
    cat = jnp.concatenate(outs, axis=-1)
    return cat @ wp.T + bp.reshape(1, -1)[0]


if __name__ == "__main__":
    # Small shapes consistent with the module's forward (n_embd scaled down).
    B, T = 2, 16
    n_embd = 128
    num_heads = 2
    head_size = n_embd // num_heads    # 64

    key = jax.random.PRNGKey(0)
    kx, kq, kk, kv, kp, kb = jax.random.split(key, 6)

    bound_in = 1.0 / (n_embd ** 0.5)
    bound_proj = 1.0 / ((num_heads * head_size) ** 0.5)

    x = jax.random.normal(kx, (B, T, n_embd), dtype=jnp.float32)
    wq = jax.random.uniform(kq, (num_heads, head_size, n_embd), jnp.float32, -bound_in, bound_in)
    wk = jax.random.uniform(kk, (num_heads, head_size, n_embd), jnp.float32, -bound_in, bound_in)
    wv = jax.random.uniform(kv, (num_heads, head_size, n_embd), jnp.float32, -bound_in, bound_in)
    wp = jax.random.uniform(kp, (n_embd, num_heads * head_size), jnp.float32, -bound_proj, bound_proj)
    bp = jax.random.uniform(kb, (1, n_embd), jnp.float32, -bound_proj, bound_proj)

    # Pack once (model-load time), then run the kernel.
    wqkv, wp_t, bp_p = pack_mha_weights(wq, wk, wv, wp, bp, n_embd)
    out = multi_head_attention_packed(x, wqkv, wp_t, bp_p,
                                      num_heads=num_heads, head_size=head_size)
    out = jax.block_until_ready(out)

    ref = reference(x, wq, wk, wv, wp, bp)
    assert out.shape == (B, T, n_embd)
    # Tolerance accounts for bf16 MXU inputs (f32 accumulation) and the approx reciprocal
    # (~2^-12 relative error) in the softmax normalization.
    assert jnp.allclose(out, ref, atol=3e-2, rtol=3e-2), "mismatch vs. pure-JAX reference"

    print("KERNEL_OK")
</pallas_src>

<mosaic_0001>
module attributes {stable_mosaic.version = 11 : i64} {
  func.func @mha_kernel(%arg0: i32, %arg1: memref<16x128xf32, #tpu.memory_space<vmem>>, %arg2: memref<128x384xbf16, #tpu.memory_space<vmem>>, %arg3: memref<128x128xbf16, #tpu.memory_space<vmem>>, %arg4: memref<1x128xf32, #tpu.memory_space<vmem>>, %arg5: memref<16x128xf32, #tpu.memory_space<vmem>>) attributes {dimension_semantics = [#tpu.dimension_semantics<parallel>], iteration_bounds = array<i64: 2>, scalar_prefetch = 0 : i64, scratch_operands = 0 : i64, tpu.core_type = #tpu.core_type<tc>, window_params = [{transform_indices = @transform_0, window_bounds = array<i64: 16, 128>}, {pipeline_mode = #tpu.pipeline_mode<synchronous>, transform_indices = @transform_1, window_bounds = array<i64: 128, 384>}, {pipeline_mode = #tpu.pipeline_mode<synchronous>, transform_indices = @transform_2, window_bounds = array<i64: 128, 128>}, {pipeline_mode = #tpu.pipeline_mode<synchronous>, transform_indices = @transform_3, window_bounds = array<i64: 1, 128>}, {transform_indices = @transform_4, window_bounds = array<i64: 16, 128>}]} {
    %c0 = arith.constant 0 : index
    %c0_0 = arith.constant 0 : index
    %0 = vector.load %arg1[%c0, %c0_0] : memref<16x128xf32, #tpu.memory_space<vmem>>, vector<16x128xf32>
    %1 = arith.truncf %0 : vector<16x128xf32> to vector<16x128xbf16>
    %c0_1 = arith.constant 0 : index
    %c0_2 = arith.constant 0 : index
    %2 = vector.load %arg2[%c0_1, %c0_2] : memref<128x384xbf16, #tpu.memory_space<vmem>>, vector<128x384xbf16>
    %cst = arith.constant dense<0.000000e+00> : vector<16x384xf32>
    %3 = tpu.matmul %1, %2, %cst {dimension_numbers = #tpu.dot_dimension_numbers<[1], [0], [0], [1], [0, 0, 1, 1], [], []>} : vector<16x128xbf16>, vector<128x384xbf16>, vector<16x384xf32> -> vector<16x384xf32>
    %4 = arith.truncf %3 : vector<16x384xf32> to vector<16x384xbf16>
    %5 = tpu.iota {dimensions = array<i32: 0>} : vector<16x16xi32>
    %6 = tpu.iota {dimensions = array<i32: 1>} : vector<16x16xi32>
    %7 = arith.cmpi sge, %5, %6 : vector<16x16xi32>
    %c0_3 = arith.constant 0 : index
    %c0_4 = arith.constant 0 : index
    %8 = vector.load %arg4[%c0_3, %c0_4] : memref<1x128xf32, #tpu.memory_space<vmem>>, vector<1x128xf32>
    %9 = vector.shape_cast %8 : vector<1x128xf32> to vector<1x128xf32>
    %10 = vector.broadcast %9 : vector<1x128xf32> to vector<16x128xf32>
    %11 = vector.extract_strided_slice %4 {offsets = [0, 0], sizes = [16, 128], strides = [1, 1]} : vector<16x384xbf16> to vector<16x128xbf16>
    %12 = vector.extract_strided_slice %4 {offsets = [0, 128], sizes = [16, 128], strides = [1, 1]} : vector<16x384xbf16> to vector<16x128xbf16>
    %13 = vector.extract_strided_slice %4 {offsets = [0, 256], sizes = [16, 128], strides = [1, 1]} : vector<16x384xbf16> to vector<16x128xbf16>
    %14 = vector.extract_strided_slice %11 {offsets = [0, 0], sizes = [16, 64], strides = [1, 1]} : vector<16x128xbf16> to vector<16x64xbf16>
    %15 = vector.extract_strided_slice %12 {offsets = [0, 0], sizes = [16, 64], strides = [1, 1]} : vector<16x128xbf16> to vector<16x64xbf16>
    %16 = vector.extract_strided_slice %13 {offsets = [0, 0], sizes = [16, 64], strides = [1, 1]} : vector<16x128xbf16> to vector<16x64xbf16>
    %cst_5 = arith.constant dense<0.000000e+00> : vector<16x16xf32>
    %17 = tpu.matmul %14, %15, %cst_5 {dimension_numbers = #tpu.dot_dimension_numbers<[1], [1], [0], [0], [0, 0, 1, 0], [], []>} : vector<16x64xbf16>, vector<16x64xbf16>, vector<16x16xf32> -> vector<16x16xf32>
    %cst_6 = arith.constant -1.000000e+30 : f32
    %18 = vector.broadcast %cst_6 : f32 to vector<16x16xf32>
    %19 = arith.select %7, %17, %18 : vector<16x16xi1>, vector<16x16xf32>
    %cst_7 = arith.constant dense<0xFF800000> : vector<16xf32>
    %20 = vector.multi_reduction <maximumf>, %19, %cst_7 [1] : vector<16x16xf32> to vector<16xf32>
    %21 = vector.shape_cast %20 : vector<16xf32> to vector<16x1xf32>
    %22 = vector.broadcast %21 : vector<16x1xf32> to vector<16x16xf32>
    %23 = arith.subf %19, %22 : vector<16x16xf32>
    %24 = math.exp %23 : vector<16x16xf32>
    %cst_8 = arith.constant dense<0.000000e+00> : vector<16xf32>
    %25 = vector.multi_reduction <add>, %24, %cst_8 [1] : vector<16x16xf32> to vector<16xf32>
    %26 = vector.shape_cast %25 : vector<16xf32> to vector<16x1xf32>
    %27 = arith.truncf %24 : vector<16x16xf32> to vector<16x16xbf16>
    %cst_9 = arith.constant dense<0.000000e+00> : vector<16x64xf32>
    %28 = tpu.matmul %27, %16, %cst_9 {dimension_numbers = #tpu.dot_dimension_numbers<[1], [0], [0], [1], [0, 0, 1, 1], [], []>} : vector<16x16xbf16>, vector<16x64xbf16>, vector<16x64xf32> -> vector<16x64xf32>
    %29 = tpu.reciprocal %26 {approx = true} : vector<16x1xf32> -> vector<16x1xf32>
    %30 = vector.broadcast %29 : vector<16x1xf32> to vector<16x64xf32>
    %31 = arith.mulf %28, %30 : vector<16x64xf32>
    %32 = arith.truncf %31 : vector<16x64xf32> to vector<16x64xbf16>
    %c0_10 = arith.constant 0 : index
    %c0_11 = arith.constant 0 : index
    %33 = vector.load %arg3[%c0_10, %c0_11] : memref<128x128xbf16, #tpu.memory_space<vmem>>, vector<64x128xbf16>
    %cst_12 = arith.constant dense<0.000000e+00> : vector<16x128xf32>
    %34 = tpu.matmul %32, %33, %cst_12 {dimension_numbers = #tpu.dot_dimension_numbers<[1], [0], [0], [1], [0, 0, 1, 1], [], []>} : vector<16x64xbf16>, vector<64x128xbf16>, vector<16x128xf32> -> vector<16x128xf32>
    %35 = arith.addf %10, %34 : vector<16x128xf32>
    %36 = vector.extract_strided_slice %11 {offsets = [0, 64], sizes = [16, 64], strides = [1, 1]} : vector<16x128xbf16> to vector<16x64xbf16>
    %37 = vector.extract_strided_slice %12 {offsets = [0, 64], sizes = [16, 64], strides = [1, 1]} : vector<16x128xbf16> to vector<16x64xbf16>
    %38 = vector.extract_strided_slice %13 {offsets = [0, 64], sizes = [16, 64], strides = [1, 1]} : vector<16x128xbf16> to vector<16x64xbf16>
    %cst_13 = arith.constant dense<0.000000e+00> : vector<16x16xf32>
    %39 = tpu.matmul %36, %37, %cst_13 {dimension_numbers = #tpu.dot_dimension_numbers<[1], [1], [0], [0], [0, 0, 1, 0], [], []>} : vector<16x64xbf16>, vector<16x64xbf16>, vector<16x16xf32> -> vector<16x16xf32>
    %cst_14 = arith.constant -1.000000e+30 : f32
    %40 = vector.broadcast %cst_14 : f32 to vector<16x16xf32>
    %41 = arith.select %7, %39, %40 : vector<16x16xi1>, vector<16x16xf32>
    %cst_15 = arith.constant dense<0xFF800000> : vector<16xf32>
    %42 = vector.multi_reduction <maximumf>, %41, %cst_15 [1] : vector<16x16xf32> to vector<16xf32>
    %43 = vector.shape_cast %42 : vector<16xf32> to vector<16x1xf32>
    %44 = vector.broadcast %43 : vector<16x1xf32> to vector<16x16xf32>
    %45 = arith.subf %41, %44 : vector<16x16xf32>
    %46 = math.exp %45 : vector<16x16xf32>
    %cst_16 = arith.constant dense<0.000000e+00> : vector<16xf32>
    %47 = vector.multi_reduction <add>, %46, %cst_16 [1] : vector<16x16xf32> to vector<16xf32>
    %48 = vector.shape_cast %47 : vector<16xf32> to vector<16x1xf32>
    %49 = arith.truncf %46 : vector<16x16xf32> to vector<16x16xbf16>
    %cst_17 = arith.constant dense<0.000000e+00> : vector<16x64xf32>
    %50 = tpu.matmul %49, %38, %cst_17 {dimension_numbers = #tpu.dot_dimension_numbers<[1], [0], [0], [1], [0, 0, 1, 1], [], []>} : vector<16x16xbf16>, vector<16x64xbf16>, vector<16x64xf32> -> vector<16x64xf32>
    %51 = tpu.reciprocal %48 {approx = true} : vector<16x1xf32> -> vector<16x1xf32>
    %52 = vector.broadcast %51 : vector<16x1xf32> to vector<16x64xf32>
    %53 = arith.mulf %50, %52 : vector<16x64xf32>
    %54 = arith.truncf %53 : vector<16x64xf32> to vector<16x64xbf16>
    %c64 = arith.constant 64 : index
    %c0_18 = arith.constant 0 : index
    %55 = vector.load %arg3[%c64, %c0_18] : memref<128x128xbf16, #tpu.memory_space<vmem>>, vector<64x128xbf16>
    %cst_19 = arith.constant dense<0.000000e+00> : vector<16x128xf32>
    %56 = tpu.matmul %54, %55, %cst_19 {dimension_numbers = #tpu.dot_dimension_numbers<[1], [0], [0], [1], [0, 0, 1, 1], [], []>} : vector<16x64xbf16>, vector<64x128xbf16>, vector<16x128xf32> -> vector<16x128xf32>
    %57 = arith.addf %35, %56 : vector<16x128xf32>
    %c0_20 = arith.constant 0 : index
    %c0_21 = arith.constant 0 : index
    %58 = vector.load %arg5[%c0_20, %c0_21] : memref<16x128xf32, #tpu.memory_space<vmem>>, vector<16x128xf32>
    tpu.vector_store %arg5[%c0_20, %c0_21], %57 {strides = array<i32>} : memref<16x128xf32, #tpu.memory_space<vmem>>, vector<16x128xf32>,
    return
  }
  func.func @transform_0(%arg0: i32) -> (i32, i32) {
    %c0_i32 = arith.constant 0 : i32
    %c0_i32_0 = arith.constant 0 : i32
    return %arg0, %c0_i32 : i32, i32
  }
  func.func @transform_1(%arg0: i32) -> (i32, i32) {
    %c0_i32 = arith.constant 0 : i32
    %c0_i32_0 = arith.constant 0 : i32
    %c0_i32_1 = arith.constant 0 : i32
    return %c0_i32, %c0_i32_0 : i32, i32
  }
  func.func @transform_2(%arg0: i32) -> (i32, i32) {
    %c0_i32 = arith.constant 0 : i32
    %c0_i32_0 = arith.constant 0 : i32
    %c0_i32_1 = arith.constant 0 : i32
    return %c0_i32, %c0_i32_0 : i32, i32
  }
  func.func @transform_3(%arg0: i32) -> (i32, i32) {
    %c0_i32 = arith.constant 0 : i32
    %c0_i32_0 = arith.constant 0 : i32
    %c0_i32_1 = arith.constant 0 : i32
    return %c0_i32, %c0_i32_0 : i32, i32
  }
  func.func @transform_4(%arg0: i32) -> (i32, i32) {
    %c0_i32 = arith.constant 0 : i32
    %c0_i32_0 = arith.constant 0 : i32
    return %arg0, %c0_i32 : i32, i32
  }
}

</mosaic_0001>

<bundles_post_ra>
// kernel: tpu_custom_call.1
= control target key start
LH: loop header
LB: loop body
LE: loop exit
PB: predicated region body
PF: predicated region fallthrough
CT: control target
= control target key end

     0   :  { %9 = vsyncpa [#allocation3], 0  ;;  %s1487_s0 = inlined_call_operand.hbm [shape: f32[32,128], index: 0, kind: input, shape index: {}]   ;;  %s1488_s1 = inlined_call_operand.hbm [shape: bf16[128,384], index: 1, kind: input, shape index: {}]   ;;  %s1489_s2 = inlined_call_operand.hbm [shape: bf16[128,128], index: 2, kind: input, shape index: {}]   ;;  %s1490_s3 = inlined_call_operand.vmem [shape: f32[1,128], index: 3, kind: input, shape index: {}]   ;;  %s1491_s4 = inlined_call_operand.hbm [shape: f32[32,128], index: 4, kind: output, shape index: {}]  }
   0x1   :  { %11 = vsyncpa [#allocation3 + $0x1], 0 }
   0x2   :  { %12 = vsyncpa [#allocation6], 0 }
   0x3   :  { %13 = vsyncpa [#allocation4], 0 }
   0x4   :  { %15 = vsyncpa [#allocation4 + $0x1], 0  ;;  %s1312_s15 = smov 0   ;;  %s1314_s16 = smov 0  }
   0x5   :  { %s1316_s17 = smov 0   ;;  %s1318_s18 = smov 0  }
   0x6 LB: > { %s1333_s19 = sadd.s32 4294967295, %s1274_s18   ;;  %s835_s20 = sadd.s32 4294967294, %s1274_s18   ;;  %s1274_s18 = sphi %s1318_s18, %s1501_s18   ;;  %s1270_s17 = sphi %s1316_s17, %s1500_s17   ;;  %s1266_s16 = sphi %s1314_s16, %s1499_s16   ;;  %s1262_s15 = sphi %s1312_s15, %s1498_s15  }
   0x7   : > { %p41_p0 = scmp.ne.s32.totalorder %s1266_s16, %s1262_s15  ;;  %p42_p1 = scmp.eq.s32.totalorder %s1333_s19, 0 }
   0x8   : > { %p128_p2 = scmp.eq.s32.totalorder %s1333_s19, 1  ;;  %p134_p3 = scmp.eq.s32.totalorder %s835_s20, 1 }
   0x9   : > { %p1342_p4 = por %p42_p1, %p41_p0  ;;  %p836_p5 = scmp.ge.s32.totalorder %s1274_s18, 1 }
   0xa   : > { %p1347_p6 = por %p134_p3, %p41_p0  ;;  %p141_p7 = scmp.lt.s32.totalorder %s1274_s18, 3 }
   0xb   : > { %s152_s25 = sshll.u32 %s1488_s1, 4  ;;  %s1276_s27 = smov [#allocation5]   ;;  %s153_s25 = int_to_ptr.hbm [resolvable:$true] %s152_s25 }
   0xc   : > { %p1355_p8 = pnand %p836_p5, %p141_p7  ;;  %s154_s28 = sshll.u32 %s1276_s27, 4  ;;  %s155_s28 = int_to_ptr.vmem [resolvable:$true] %s154_s28 }
   0xd   : > { %s166_s5 = sshll.u32 %s1489_s2, 4  ;;  %s1277_s6 = smov 192   ;;  %s167_s5 = int_to_ptr.hbm [resolvable:$true] %s166_s5 }
   0xe   : > { %p1033_p9 = pneg %p1355_p8  ;;  %s1278_s7 = smov 12  }
   0xf   : > { %s1279_s8 = smov [#allocation7]   ;;  %s1280_s10 = smov 64  }
  0x10   : > { %p1034_p10 = pnand %p1033_p9, %p42_p1  ;;  %s168_s9 = sshll.u32 %s1279_s8, 4  ;;  %s169_s9 = int_to_ptr.vmem [resolvable:$true] %s168_s9 }
  0x11   : > { %s1281_s11 = smov 4   ;;  %s1368_s12 = sadd.s32 1, %s1274_s18  }
  0x12   : > { %1036 = dma.hbm_to_vmem [thread:$0]  (!%p1034_p10), %s153_s25, 3072, %s155_s28, [#allocation6], %s1277_s6, %s1277_s6, %s1278_s7  }
  0x13   : > { %1039 = dma.hbm_to_vmem [thread:$0]  (!%p1034_p10), %s167_s5, 1024, %s169_s9, [#allocation6], %s1280_s10, %s1280_s10, %s1281_s11  }
  0x14   : > { %s25_s13 = ssub.s32 %s1274_s18, %s1368_s12  ;;  %s28_s14 = sadd.s32 1, %s1270_s17 }
  0x15   : > { %p26_p12 = scmp.eq.s32.totalorder %s25_s13, 0  ;;  %p35_p13 = scmp.ne.s32.totalorder %s1270_s17, %s1266_s16 }
  0x16   : > { %p36_p0 = scmp.eq.s32.totalorder %s1274_s18, 0  ;;  %p1050_p7 = scmp.lt.s32.totalorder %s1274_s18, 2 }
  0x17   : > { %s1377_s20 = scalar_select %p26_p12, %s1270_s17, %s28_s14  }
  0x18   : > { %p37_p3 = por %p36_p0, %p35_p13  ;;  %p1381_p5 = por %p128_p2, %p35_p13 }
  0x19   : > { %s185_s24 = sand.u32 1, %s1270_s17   ;;  %s987_s27 = sshll.u32 %s1274_s18, 4 }
  0x1a   : > { %s840_s25 = sshll.u32 %s185_s24, 4  ;;  %s194_s30 = scalar_lea.hbm %s1487_s0, %s987_s27 }
  0x1b   : > { %s189_s5 = scalar_lea.vmem [#allocation2], %s840_s25  ;;  %s195_s7 = sshll.u32 %s194_s30, 4  ;;  %s196_s7 = int_to_ptr.hbm [resolvable:$true] %s195_s7 }
  0x1c   : > { %s197_s6 = sshll.u32 %s189_s5, 4  ;;  %p1391_p9 = pnand %p1050_p7, %p37_p3  ;;  %s198_s6 = int_to_ptr.vmem [resolvable:$true] %s197_s6 }
  0x1d   : > { %s186_s9 = scalar_lea.sflag [#allocation3], %s185_s24  ;;  %s1174_s10 = sshra.s32 %s196_s7, 4  ;;  %s1175_s10 = int_to_ptr.hbm [resolvable:$true] %s1174_s10 }
  0x1e   : > { %s1176_s11 = scalar_lea.hbm %s1175_s10, 16  ;;  %p1178_p10 = pneg %p1391_p9 }
  0x1f   : > { %p1177_p2 = scmp.ne.s32.totalorder %s1175_s10, %s1176_s11  ;;  %s1181_s25 = scalar_lea.hbm %s1487_s0, 32 }
  0x20   : > { %p1182_p0 = scmp.lt.s32.totalorder %s1175_s10, %s1487_s0  ;;  %p1183_p3 = scmp.lt.s32.totalorder %s1181_s25, %s1176_s11 }
  0x21   : > { %p1179_p12 = pnand %p1178_p10, %p1177_p2 }
  0x22   : > { %p1184_p7 = por %p1183_p3, %p1182_p0 }
  0x23   : > { %p1180_p13 = pneg %p1179_p12 }
  0x25   : > { %p1185_p11 = pnand %p1184_p7, %p1180_p13 }
  0x27   : > { %1188 = shalt.err (!%p1185_p11)
}
  0x28   : > { %s1282_s24 = smov 128   ;;  %s1283_s29 = smov 8  }
  0x29   : > { %1043 = dma.hbm_to_vmem [thread:$0]  (!%p1391_p9), %s196_s7, 256, %s198_s6, %s186_s9, %s1282_s24, %s1282_s24, %s1283_s29  }
  0x2a   : > { %209 = sbr.rel (%p1355_p8) target bundleno = 897 (0x381), region = 36  ;;  %s1408_s30 = sand.u32 (!%p1355_p8), 1, %s1266_s16  }
  0x2b   : > { %s844_s5 = sshll.u32 (!%p1355_p8), %s1408_s30, 4  ;;  %s212_s10 = scalar_lea.sflag (!%p1355_p8), [#allocation3], %s1408_s30 }
  0x2c   : > { %s1414_s11 = scalar_lea.vmem (!%p1355_p8), [#allocation2], %s844_s5 }
  0x2f   : > { %1249 = dma.done.wait (%p1342_p4), %s212_s10, 256  }
  0x30   : > { %1251 = vsyncadd (%p1342_p4), %s212_s10, 4294967040 }
  0x31   : > { %1253 = dma.done.wait (%p42_p1), [#allocation6], 4096  }
  0x32   : > { %1255 = vsyncadd (%p42_p1), [#allocation6], 4294963200  ;;  %v934_v0 = vld [vmem:[#allocation5 + $0xa8] sm:$0xf]  ;;  %v1010_v1 = vld [vmem:[#allocation5 + $0xb0] sm:$0xf0] }
  0x33   : > { %v1009_v2 = vld [vmem:[#allocation5 + $0xac] sm:$0xf]  ;;  %v935_v3 = vor.u32 %v1010_v1, %v934_v0  ;;  %v936_v4 = vld [vmem:[#allocation5 + $0xb4] sm:$0xf0]  ;;  %v922_v5 = vld [vmem:[#allocation5 + $0x90] sm:$0xf] }
  0x34   : > { %v1007_v6 = vld [vmem:[#allocation5 + $0x98] sm:$0xf0]  ;;  %v939_v7 = vor.u32 %v1009_v2, %v936_v4  ;;  %v1006_v8 = vld [vmem:[#allocation5 + $0x94] sm:$0xf]  ;;  %v924_v9 = vld [vmem:[#allocation5 + $0x9c] sm:$0xf0] }
  0x35   : > { %417 = vmatpush.bf16.msra.mxu0 %v935_v3  ;;  %v923_v10 = vor.u32 %v1007_v6, %v922_v5  ;;  %v927_v11 = vor.u32 %v1006_v8, %v924_v9  ;;  %v910_v12 = vld [vmem:[#allocation5 + $0x78] sm:$0xf]  ;;  %v1004_v13 = vld [vmem:[#allocation5 + $0x80] sm:$0xf0]  ;;  %v1003_v14 = vld [vmem:[#allocation5 + $0x7c] sm:$0xf] }
  0x36   : > { %431 = vmatpush.bf16.msra.mxu1 %v939_v7  ;;  %v912_v15 = vld [vmem:[#allocation5 + $0x84] sm:$0xf0]  ;;  %v911_v16 = vor.u32 %v1004_v13, %v910_v12  ;;  %v898_v18 = vld [vmem:[#allocation5 + $0x60] sm:$0xf]  ;;  %v1001_v19 = vld [vmem:[#allocation5 + $0x68] sm:$0xf0] }
  0x37   : > { %v915_v17 = vor.u32 %v1003_v14, %v912_v15  ;;  %v1000_v20 = vld [vmem:[#allocation5 + $0x64] sm:$0xf]  ;;  %v900_v21 = vld [vmem:[#allocation5 + $0x6c] sm:$0xf0]  ;;  %v899_v22 = vor.u32 %v1001_v19, %v898_v18  ;;  %v886_v24 = vld [vmem:[#allocation5 + $0x48] sm:$0xf] }
  0x38   : > { %v903_v23 = vor.u32 %v1000_v20, %v900_v21  ;;  %v998_v25 = vld [vmem:[#allocation5 + $0x50] sm:$0xf0]  ;;  %v997_v26 = vld [vmem:[#allocation5 + $0x4c] sm:$0xf]  ;;  %v888_v27 = vld [vmem:[#allocation5 + $0x54] sm:$0xf0] }
  0x39   : > { %418 = vmatpush.bf16.msra.mxu0 %v923_v10  ;;  %v887_v28 = vor.u32 %v998_v25, %v886_v24  ;;  %v891_v29 = vor.u32 %v997_v26, %v888_v27  ;;  %v874_v30 = vld [vmem:[#allocation5 + $0x30] sm:$0xf]  ;;  %v995_v31 = vld [vmem:[#allocation5 + $0x38] sm:$0xf0]  ;;  %v994_v32 = vld [vmem:[#allocation5 + $0x34] sm:$0xf]  ;;  %v463_v27 = vlaneseq }
  0x3a   : > { %432 = vmatpush.bf16.msra.mxu1 %v927_v11  ;;  %v876_v33 = vld [vmem:[#allocation5 + $0x3c] sm:$0xf0]  ;;  %v875_v34 = vor.u32 %v995_v31, %v874_v30  ;;  %v862_v36 = vld [vmem:[#allocation5 + $0x18] sm:$0xf]  ;;  %v992_v37 = vld [vmem:[#allocation5 + $0x20] sm:$0xf0] }
  0x3b   : > { %v879_v35 = vor.u32 %v994_v32, %v876_v33  ;;  %v991_v38 = vld [vmem:[#allocation5 + $0x1c] sm:$0xf]  ;;  %v864_v39 = vld [vmem:[#allocation5 + $0x24] sm:$0xf0]  ;;  %v863_v40 = vor.u32 %v992_v37, %v862_v36  ;;  %v850_v42 = vld [vmem:[#allocation5] sm:$0xf] }
  0x3c   : > { %v867_v41 = vor.u32 %v991_v38, %v864_v39  ;;  %v989_v43 = vld [vmem:[#allocation5 + $0x8] sm:$0xf0]  ;;  %v988_v44 = vld [vmem:[#allocation5 + $0x4] sm:$0xf]  ;;  %v852_v45 = vld [vmem:[#allocation5 + $0xc] sm:$0xf0] }
  0x3d   : > { %419 = vmatpush.bf16.msra.mxu0 %v911_v16  ;;  %v851_v46 = vor.u32 %v989_v43, %v850_v42  ;;  %v254_v47 = vld [vmem:[%s1414_s11] sm:$0xff]  ;;  %v255_v48 = vld [vmem:[%s1414_s11 + $0x8] sm:$0xff]  ;;  %v855_v49 = vor.u32 %v988_v44, %v852_v45  ;;  %vm482_vm0 = vcmask 523264   ;;  %s1284_s21 = smov 64   ;;  %vm505_vm2 = vcmask 130048   ;;  %s1020_s7 = sshll.u32 %s1333_s19, 4 }
  0x3e   : > { %433 = vmatpush.bf16.msra.mxu1 %v915_v17  ;;  %v256_v50 = vpack.c.bf16 %v255_v48, %v254_v47  ;;  %v942_v51 = vld [vmem:[#allocation5 + $0xb0] sm:$0xf]  ;;  %v1011_v52 = vld [vmem:[#allocation5 + $0xb8] sm:$0xf0]  ;;  %v930_v53 = vld [vmem:[#allocation5 + $0x98] sm:$0xf]  ;;  %s739_s13 = scalar_lea.hbm %s1491_s4, %s1020_s7 }
  0x3f   : > { %v943_v54 = vor.u32 %v1011_v52, %v942_v51  ;;  %v1008_v55 = vld [vmem:[#allocation5 + $0xa0] sm:$0xf0]  ;;  %v918_v57 = vld [vmem:[#allocation5 + $0x80] sm:$0xf]  ;;  %v1005_v58 = vld [vmem:[#allocation5 + $0x88] sm:$0xf0] }
  0x40   : > { %v931_v56 = vor.u32 %v1008_v55, %v930_v53  ;;  %v919_v59 = vor.u32 %v1005_v58, %v918_v57  ;;  %v906_v61 = vld [vmem:[#allocation5 + $0x68] sm:$0xf]  ;;  %v1002_v62 = vld [vmem:[#allocation5 + $0x70] sm:$0xf0]  ;;  %v894_v1 = vld [vmem:[#allocation5 + $0x50] sm:$0xf] }
  0x41   : > { %420 = vmatpush.bf16.msra.mxu0 %v899_v22  ;;  %445 = vmatpush.bf16.msra.mxu2 %v943_v54  ;;  %v907_v0 = vor.u32 %v1002_v62, %v906_v61  ;;  %v999_v2 = vld [vmem:[#allocation5 + $0x58] sm:$0xf0]  ;;  %v882_v6 = vld [vmem:[#allocation5 + $0x38] sm:$0xf]  ;;  %v996_v7 = vld [vmem:[#allocation5 + $0x40] sm:$0xf0] }
  0x42   : > { %434 = vmatpush.bf16.msra.mxu1 %v903_v23  ;;  %v895_v3 = vor.u32 %v999_v2, %v894_v1  ;;  %v883_v10 = vor.u32 %v996_v7, %v882_v6  ;;  %v870_v13 = vld [vmem:[#allocation5 + $0x20] sm:$0xf]  ;;  %v993_v14 = vld [vmem:[#allocation5 + $0x28] sm:$0xf0]  ;;  %v858_v18 = vld [vmem:[#allocation5 + $0x8] sm:$0xf] }
  0x43   : > { %v871_v16 = vor.u32 %v993_v14, %v870_v13  ;;  %v990_v19 = vld [vmem:[#allocation5 + $0x10] sm:$0xf0]  ;;  %v1015_v62 = vld [vmem:[#allocation7 + $0x18] sm:$0xff]  ;;  %s250_s14 = scalar_lea.vmem [#allocation8], %s844_s5  ;;  %s742_s27 = sshll.u32 %s739_s13, 4  ;;  %s743_s27 = int_to_ptr.hbm [resolvable:$true] %s742_s27 }
  0x44   : > { %v859_v21 = vor.u32 %v990_v19, %v858_v18  ;;  %v1014_v7 = vld [vmem:[#allocation7 + $0x10] sm:$0xff]  ;;  %s740_s25 = sshll.u32 %s250_s14, 4  ;;  %s728_s19 = scalar_lea.sflag [#allocation4], %s1408_s30  ;;  %s741_s25 = int_to_ptr.vmem [resolvable:$true] %s740_s25 }
  0x45   : > { %421 = vmatpush.bf16.msra.mxu0 %v887_v28  ;;  %446 = vmatpush.bf16.msra.mxu2 %v931_v56  ;;  %v464_v28 = vshrl.u32 %v463_v27, 7  ;;  %s1218_s28 = sshra.s32 %s743_s27, 4  ;;  %s1224_s10 = scalar_lea.hbm %s1491_s4, 32  ;;  %s1219_s28 = int_to_ptr.hbm [resolvable:$true] %s1218_s28 }
  0x46   : > { %435 = vmatpush.bf16.msra.mxu1 %v891_v29  ;;  %v467_v29 = vand.u32 127, %v463_v27  ;;  %s1220_s24 = scalar_lea.hbm %s1219_s28, 16  ;;  %p1225_p11 = scmp.lt.s32.totalorder %s1219_s28, %s1491_s4 }
  0x47   : > { %v465_v33 = vadd.s32 8, %v464_v28  ;;  %p1221_p1 = scmp.ne.s32.totalorder %s1219_s28, %s1220_s24  ;;  %p1226_p9 = scmp.lt.s32.totalorder %s1224_s10, %s1220_s24 }
  0x48   : > { %vm468_vm1 = vcmp.ge.s32.totalorder %v464_v28, %v467_v29 }
  0x49   : > { %422 = vmatpush.bf16.msra.mxu0 %v875_v34  ;;  %447 = vmatpush.bf16.msra.mxu2 %v919_v59  ;;  %vm469_vm3 = vcmp.ge.s32.totalorder %v465_v33, %v467_v29  ;;  %p1222_p4 = pnand %p1221_p1, %p1381_p5  ;;  %p1227_p2 = por %p1226_p9, %p1225_p11 }
  0x4a   : > { %436 = vmatpush.bf16.msra.mxu1 %v879_v35 }
  0x4b   : > { %p1223_p8 = pneg %p1222_p4 }
  0x4d   : > { %423 = vmatpush.bf16.msra.mxu0 %v863_v40  ;;  %448 = vmatpush.bf16.msra.mxu2 %v907_v0  ;;  %p1228_p10 = pnand %p1227_p2, %p1223_p8 }
  0x4e   : > { %437 = vmatpush.bf16.msra.mxu1 %v867_v41 }
  0x51   : > { %424 = vmatpush.bf16.msra.mxu0 %v851_v46  ;;  %449 = vmatpush.bf16.msra.mxu2 %v895_v3 }
  0x52   : > { %438 = vmatpush.bf16.msra.mxu1 %v855_v49 }
  0x54   : > { %425 = vmatmul.bf16.vlgmr.msra.gmra.mxu0 %v256_v50 }
  0x55   : > { %439 = vmatmul.bf16.vlgmr.msra.gmra.mxu1 %v256_v50  ;;  %450 = vmatpush.bf16.msra.mxu2 %v883_v10 }
  0x59   : > { %451 = vmatpush.bf16.msra.mxu2 %v871_v16 }
  0x5d   : > { %452 = vmatpush.bf16.msra.mxu2 %v859_v21 }
  0x60   : > { %453 = vmatmul.bf16.vlgmr.msra.gmra.mxu2 %v256_v50 }
  0xd1   : > { %v426_v60 = vpop.f32.mrf.mxu0 }
  0xd2   : > { %v440_v63 = vpop.f32.mrf.mxu1 }
  0xd3   : > { %v459_v4 = vpack.c.bf16 %v440_v63, %v426_v60 }
  0xd5   : > { %v479_v11 = vunpack.c.h.b16 %v459_v4  ;;  %v476_v22 = vunpack.c.l.b16 %v459_v4 }
  0xd9   : > { %v428_v5 = vpop.f32.mrf.mxu0 }
  0xda   : > { %v442_v8 = vpop.f32.mrf.mxu1 }
  0xdb   : > { %v461_v9 = vpack.c.bf16 %v442_v8, %v428_v5  ;;  %v1013_v8 = vld [vmem:[#allocation7 + $0x8] sm:$0xff] }
  0xdd   : > { %v480_v12 = vunpack.c.h.b16 %v461_v9  ;;  %v477_v20 = vunpack.c.l.b16 %v461_v9 }
  0xdf   : > { %v481_v15 = vpack.c.b16 %v480_v12, %v479_v11  ;;  %v478_v23 = vpack.c.b16 %v477_v20, %v476_v22  ;;  %v1012_v12 = vld [vmem:[#allocation7] sm:$0xff]  ;;  %v1019_v22 = vld [vmem:[#allocation7 + $0x38] sm:$0xff] }
  0xe0   : > { %713 = vmatpush.bf16.msrb.mxu2 %v1019_v22 }
  0xe1   : > { %606 = vrot.lane.b32.xlu0 %v481_v15, %s1284_s21  ;;  %v487_v17 = vsel %vm482_vm0, %v481_v15, 0 }
  0xe2   : > { %496 = vmatpush.bf16.xpose.msra.mxu3 %v487_v17 }
  0xe3   : > { %v454_v37 = vpop.f32.mrf.mxu2 }
  0xe4   : > { %v460_v39 = vpack.c.bf16 %v454_v37, %v454_v37 }
  0xe6   : > { %v527_v41 = vunpack.c.l.b16 %v460_v39 }
  0xe9   : > { %604 = vrot.lane.b32.xlu0 %v478_v23, %s1284_s21  ;;  %944 = vmatmul.msk.bf16.vlgmr.msra.gmra.mxu3 %vm482_vm0, %v478_v23  ;;  %v1018_v23 = vld [vmem:[#allocation7 + $0x30] sm:$0xff] }
  0xea   : > { %714 = vmatpush.bf16.msrb.mxu2 %v1018_v23 }
  0xeb   : > { %v456_v38 = vpop.f32.mrf.mxu2 }
  0xec   : > { %v462_v40 = vpack.c.bf16 %v456_v38, %v456_v38 }
  0xee   : > { %v528_v42 = vunpack.c.l.b16 %v462_v40 }
  0xf0   : > { %v529_v43 = vpack.c.b16 %v528_v42, %v527_v41 }
  0xf2   : > { %541 = vmatpush.bf16.msrb.mxu3 %v529_v43  ;;  %649 = vrot.lane.b32.xlu0 %v529_v43, %s1284_s21 }
  0xf6   : > { %592 = vmatpush.bf16.msra.mxu3 %v1015_v62 }
  0xfa   : > { %593 = vmatpush.bf16.msra.mxu3 %v1014_v7 }
  0xfe   : > { %594 = vmatpush.bf16.msra.mxu3 %v1013_v8 }
 0x102   : > { %595 = vmatpush.bf16.msra.mxu3 %v1012_v12 }
 0x153   : > { %v607_v24 = vpop.permute.xlu0 %606 }
 0x154   : > { %v612_v25 = vsel %vm482_vm0, %v607_v24, 0  ;;  %v1017_v24 = vld [vmem:[#allocation7 + $0x28] sm:$0xff] }
 0x155   : > { %621 = vmatpush.bf16.xpose.msrb.mxu0 %v612_v25  ;;  %715 = vmatpush.bf16.msrb.mxu2 %v1017_v24  ;;  %v1016_v25 = vld [vmem:[#allocation7 + $0x20] sm:$0xff] }
 0x159   : > { %716 = vmatpush.bf16.msrb.mxu2 %v1016_v25 }
 0x15b   : > { %v605_v26 = vpop.permute.xlu0 %604 }
 0x15c   : > { %963 = vmatmul.msk.bf16.vlgmr.msrb.gmra.mxu0 %vm482_vm0, %v605_v26 }
 0x164   : > { %v650_v61 = vpop.permute.xlu0 %649 }
 0x165   : > { %662 = vmatpush.bf16.msrb.mxu1 %v650_v61 }
 0x16c   : > { %v498_v30 = vpop.f32.mrf.mxu3 }
 0x16d   : > { %v503_v31 = vsel %vm468_vm1, %v498_v30, -1e+30 }
 0x16e   : > { %v506_v32 = vsel %vm505_vm2, %v503_v31, -inf }
 0x16f   : > { %507 = vmax.xlane.f32.xlu1 %v506_v32 }
 0x174   : > { %v500_v34 = vpop.f32.mrf.mxu3 }
 0x175   : > { %v504_v35 = vsel %vm469_vm3, %v500_v34, -1e+30 }
 0x176   : > { %v509_v36 = vsel %vm505_vm2, %v504_v35, -inf }
 0x177   : > { %510 = vmax.xlane.f32.xlu1 %v509_v36  ;;  %v1097_v36 = vld [vmem:[%s1490_s3] ss:$0 sm:$0xff] }
 0x1d9   : > { %v623_v44 = vpop.f32.mrf.mxu0 }
 0x1da   : > { %v628_v45 = vsel %vm468_vm1, %v623_v44, -1e+30 }
 0x1db   : > { %v630_v46 = vsel %vm505_vm2, %v628_v45, -inf }
 0x1dc   : > { %631 = vmax.xlane.f32.xlu2 %v630_v46 }
 0x1e1   : > { %v625_v47 = vpop.f32.mrf.mxu0 }
 0x1e2   : > { %v629_v48 = vsel %vm469_vm3, %v625_v47, -1e+30  ;;  %v508_v49 = vpop.xlane.xlu1 %507 }
 0x1e3   : > { %v512_v50 = vsub.f32 %v503_v31, %v508_v49  ;;  %v633_v51 = vsel %vm505_vm2, %v629_v48, -inf }
 0x1e4   : > { %634 = vmax.xlane.f32.xlu2 %v633_v51 }
 0x1e5   : > { %v514_v52 = vmul.f32 1.442695, %v512_v50 }
 0x1e7   : > { %1098 = vpow2.f32 %v514_v52 }
 0x1ea   : > { %v511_v53 = vpop.xlane.xlu1 %510 }
 0x1eb   : > { %v513_v54 = vsub.f32 %v504_v35, %v511_v53 }
 0x1ed   : > { %v1099_v55 = vpop.eup %1098  ;;  %v516_v56 = vmul.f32 1.442695, %v513_v54 }
 0x1ee   : > { %v518_v57 = vsel %vm505_vm2, %v1099_v55, 0.0 }
 0x1ef   : > { %1100 = vpow2.f32 %v516_v56  ;;  %519 = vadd.xlane.f32.xlu1 %v518_v57 }
 0x1f5   : > { %v1101_v58 = vpop.eup %1100 }
 0x1f6   : > { %v521_v59 = vsel %vm505_vm2, %v1101_v58, 0.0  ;;  %v524_v60 = vpack.c.bf16 %v1101_v58, %v1099_v55 }
 0x1f7   : > { %522 = vadd.xlane.f32.xlu2 %v521_v59 }
 0x1f8   : > { %945 = vmatmul.msk.bf16.vlgmr.msrb.gmra.mxu3 %vm505_vm2, %v524_v60 }
 0x24f   : > { %v632_v63 = vpop.xlane.xlu2 %631 }
 0x250   : > { %v636_v0 = vsub.f32 %v628_v45, %v632_v63 }
 0x252   : > { %v638_v1 = vmul.f32 1.442695, %v636_v0 }
 0x254   : > { %1102 = vpow2.f32 %v638_v1 }
 0x257   : > { %v635_v2 = vpop.xlane.xlu2 %634 }
 0x258   : > { %v637_v3 = vsub.f32 %v629_v48, %v635_v2 }
 0x25a   : > { %v1103_v4 = vpop.eup %1102  ;;  %v640_v5 = vmul.f32 1.442695, %v637_v3 }
 0x25b   : > { %v642_v6 = vsel %vm505_vm2, %v1103_v4, 0.0 }
 0x25c   : > { %1104 = vpow2.f32 %v640_v5  ;;  %643 = vadd.xlane.f32.xlu0 %v642_v6 }
 0x262   : > { %v1105_v9 = vpop.eup %1104  ;;  %v520_v13 = vpop.xlane.xlu1 %519 }
 0x263   : > { %v645_v10 = vsel %vm505_vm2, %v1105_v9, 0.0  ;;  %v648_v11 = vpack.c.bf16 %v1105_v9, %v1103_v4  ;;  %1106 = vrcp.f32 %v520_v13 }
 0x264   : > { %646 = vadd.xlane.f32.xlu1 %v645_v10 }
 0x265   : > { %964 = vmatmul.msk.bf16.vlgmr.msrb.gmra.mxu1 %vm505_vm2, %v648_v11 }
 0x269   : > { %v1107_v16 = vpop.eup %1106 }
 0x26a   : > { %v523_v14 = vpop.xlane.xlu2 %522 }
 0x26b   : > { %1108 = vrcp.f32 %v523_v14 }
 0x271   : > { %v1109_v17 = vpop.eup %1108 }
 0x27b   : > { %v543_v15 = vpop.f32.mrf.mxu3 }
 0x27c   : > { %v550_v19 = vmul.f32 %v1107_v16, %v543_v15 }
 0x283   : > { %v545_v18 = vpop.f32.mrf.mxu3 }
 0x284   : > { %v551_v20 = vmul.f32 %v1109_v17, %v545_v18 }
 0x286   : > { %v552_v21 = vpack.c.bf16 %v551_v20, %v550_v19 }
 0x288   : > { %962 = vmatmul.msk.bf16.vlgmr.msra.gmra.mxu3 %vm482_vm0, %v552_v21 }
 0x2cf   : > { %v644_v26 = vpop.xlane.xlu0 %643 }
 0x2d0   : > { %1110 = vrcp.f32 %v644_v26 }
 0x2d6   : > { %v1111_v29 = vpop.eup %1110 }
 0x2d7   : > { %v647_v27 = vpop.xlane.xlu1 %646 }
 0x2d8   : > { %1112 = vrcp.f32 %v647_v27 }
 0x2de   : > { %v1113_v30 = vpop.eup %1112 }
 0x2e2   : > { %v664_v28 = vpop.f32.mrf.mxu1 }
 0x2e3   : > { %v671_v32 = vmul.f32 %v1111_v29, %v664_v28 }
 0x2ea   : > { %v666_v31 = vpop.f32.mrf.mxu1 }
 0x2eb   : > { %v672_v33 = vmul.f32 %v1113_v30, %v666_v31 }
 0x2ed   : > { %v673_v34 = vpack.c.bf16 %v672_v33, %v671_v32 }
 0x2ef   : > { %981 = vmatmul.msk.bf16.vlgmr.msrb.gmra.mxu2 %vm482_vm0, %v673_v34 }
 0x30b   : > { %v597_v35 = vpop.f32.mrf.mxu3 }
 0x30c   : > { %v602_v37 = vadd.f32 %v1097_v36, %v597_v35 }
 0x313   : > { %v599_v40 = vpop.f32.mrf.mxu3 }
 0x314   : > { %v603_v41 = vadd.f32 %v1097_v36, %v599_v40 }
 0x372   : > { %v718_v38 = vpop.f32.mrf.mxu2 }
 0x373   : > { %v723_v39 = vadd.f32 %v718_v38, %v602_v37 }
 0x375   : > { %725 = vst [vmem:[%s250_s14] sm:$0xff] %v723_v39 }
 0x37a   : > { %v720_v42 = vpop.f32.mrf.mxu2 }
 0x37b   : > { %v724_v43 = vadd.f32 %v720_v42, %v603_v41 }
 0x37d   : > { %726 = vst [vmem:[%s250_s14 + $0x8] sm:$0xff] %v724_v43 }
 0x37e   : > { %1231 = shalt.err (!%p1228_p10)
}
 0x37f   : > { %s1285_s30 = smov 128   ;;  %s1286_s26 = smov 8  }
 0x380   : > { %1031 = dma.vmem_to_hbm [thread:$0]  (%p1381_p5), %s741_s25, 256, %s743_s27, %s728_s19, %s1285_s30, %s1285_s30, %s1286_s26  }
 0x381 PF: > { %s757_s6 = sand.u32 1, %s1262_s15   ;;  %p1497_p12 = scmp.ge.s32.totalorder %s1274_s18, 2 }
 0x382   : > { %s758_s7 = scalar_lea.sflag [#allocation4], %s757_s6 }
 0x383   : > { %p1045_p13 = pnand %p1497_p12, %p1347_p6 }
 0x385   : > { %p1046_p0 = pneg %p1045_p13 }
 0x387   : > { %1257 = dma.done.wait (%p1046_p0), %s758_s7, 256  }
 0x388   : > { %1259 = vsyncadd (%p1046_p0), %s758_s7, 4294967040  ;;  %p18_p3 = scmp.ge.s32.totalorder %s1368_s12, 4   ;;  %s1498_s15 = smov %s1266_s16 }
 0x389   : > { %s1499_s16 = smov %s1270_s17  ;;  %s1500_s17 = smov %s1377_s20 }
 0x38a   : > { %s1501_s18 = smov %s1368_s12  ;;  %20 = sbr.rel (!%p18_p3) target bundleno = 6 (0x6), region = 89 }
 0x38f   :  { %764 = vsyncpa [#allocation3], 1 }
 0x390   :  { %766 = vsyncpa [#allocation3 + $0x1], 1 }
 0x391   :  { %767 = vsyncpa [#allocation6], 1 }
 0x392   :  { %768 = vsyncpa [#allocation4], 1 }
 0x393   :  { %770 = vsyncpa [#allocation4 + $0x1], 1 }

</bundles_post_ra>
